<compile_context>
chip_gen: v6e
topology: v6e:2x2x1
jax: 0.10.0
libtpu: 0.0.40
codegen_flags: <defaults>
</compile_context>

<pallas_src>
import functools

import jax
import jax.numpy as jnp
from jax.experimental import pallas as pl
from jax.experimental.pallas import tpu as pltpu

EPS = 1e-5  # torch nn.LayerNorm default
_VMEM_LIMIT = 64 * 1024 * 1024


# ----------------------------- small helpers -----------------------------

def _cp(semantics):
    return pltpu.CompilerParams(dimension_semantics=semantics,
                                vmem_limit_bytes=_VMEM_LIMIT)


def _round_up(x, m):
    return ((x + m - 1) // m) * m


def _row_plan(R, max_tile):
    """Row-tiling plan -> (tile, padded_R).

    Prefers an exact multiple-of-8 divisor of R (>= 64, no padding); small R uses one full
    block; otherwise pads R up to a multiple of max_tile (caller slices the pad off)."""
    if R <= max_tile:
        return R, R
    t = max_tile
    while t >= 64:
        if R % t == 0:
            return t, R
        t -= 8
    return max_tile, _round_up(R, max_tile)


def _const_wspec(shape):
    """BlockSpec for a weight revisited at the same block index every grid step:
    single-buffered (second pipeline buffer is dead VMEM)."""
    try:
        return pl.BlockSpec(shape, lambda *_: (0,) * len(shape),
                            pipeline_mode=pl.Buffered(1))
    except (TypeError, AttributeError):   # older JAX without pipeline_mode
        return pl.BlockSpec(shape, lambda *_: (0,) * len(shape))


def _layernorm(x, g, b):
    mu = jnp.mean(x, axis=-1, keepdims=True)
    var = jnp.mean(jnp.square(x - mu), axis=-1, keepdims=True)
    return (x - mu) * jax.lax.rsqrt(var + EPS) * g + b


def _quick_gelu(x):
    return x * jax.nn.sigmoid(1.702 * x)


def _dot(a, b):
    return jax.lax.dot_general(a, b, (((1,), (0,)), ((), ())),
                               preferred_element_type=jnp.float32)


def _dot_nt(a, b):  # a @ b.T without an explicit transpose
    return jax.lax.dot_general(a, b, (((1,), (1,)), ((), ())),
                               preferred_element_type=jnp.float32)


def _bf16(x):
    return x.astype(jnp.bfloat16)


# ----------------------------- Pallas kernels -----------------------------

def _patch_embed_kernel(x_ref, w_ref, pos_ref, g_ref, b_ref, o_ref):
    # fused: patch matmul (Conv3d k=s=(1,P,P), no bias) + positional embedding + ln_pre
    tok = _dot(x_ref[0], w_ref[...])                       # bf16 x bf16 -> f32 acc, (HW, C)
    tok = tok + pos_ref[...]
    o_ref[0] = _layernorm(tok, g_ref[...], b_ref[...])


def patch_embed(patches, w_patch, pos_sp, g, b):
    NT, HW, K = patches.shape
    C = w_patch.shape[1]
    return pl.pallas_call(
        _patch_embed_kernel,
        out_shape=jax.ShapeDtypeStruct((NT, HW, C), jnp.float32),
        grid=(NT,),
        in_specs=[pl.BlockSpec((1, HW, K), lambda i: (i, 0, 0)),
                  _const_wspec((K, C)),
                  _const_wspec((HW, C)),
                  pl.BlockSpec((1, C), lambda i: (0, 0)),
                  pl.BlockSpec((1, C), lambda i: (0, 0))],
        out_specs=pl.BlockSpec((1, HW, C), lambda i: (i, 0, 0)),
        compiler_params=_cp(("parallel",)),
    )(patches, w_patch, pos_sp, g, b)


def _layernorm_kernel(x_ref, g_ref, b_ref, o_ref):
    o_ref[...] = _layernorm(x_ref[...], g_ref[...], b_ref[...])


def layernorm(x, g, b, max_tile=512):
    shape = x.shape
    C = shape[-1]
    x2 = x.reshape(-1, C)
    R = x2.shape[0]
    tr, Rp = _row_plan(R, max_tile)
    if Rp != R:
        x2 = jnp.concatenate([x2, jnp.zeros((Rp - R, C), x2.dtype)], axis=0)
    out = pl.pallas_call(
        _layernorm_kernel,
        out_shape=jax.ShapeDtypeStruct((Rp, C), jnp.float32),
        grid=(Rp // tr,),
        in_specs=[pl.BlockSpec((tr, C), lambda i: (i, 0)),
                  pl.BlockSpec((1, C), lambda i: (0, 0)),
                  pl.BlockSpec((1, C), lambda i: (0, 0))],
        out_specs=pl.BlockSpec((tr, C), lambda i: (i, 0)),
        compiler_params=_cp(("parallel",)),
    )(x2, g, b)
    if Rp != R:
        out = out[:R]
    return out.reshape(shape)


def _attn_block_kernel(cls_ref, xs_ref, g_ref, b_ref, wqkv_ref, bqkv_ref,
                       wo_ref, bo_ref, ocls_ref, oxs_ref, x_scr, heads_scr,
                       *, num_heads):
    # fused: x + out_proj(MHA(ln_1(x)))  with x = [spatial tokens ; cls token]
    _, HW, C = xs_ref.shape
    L = HW + 1
    D = C // num_heads
    scale = 1.0 / float(D) ** 0.5

    # Assemble the full token sequence with spatial tokens FIRST and cls LAST: softmax attention
    # is permutation-equivariant and this keeps the big spatial load/store sublane-aligned.
    x_scr[pl.ds(0, HW), :] = xs_ref[0]
    x_scr[pl.ds(HW, 1), :] = cls_ref[0]
    x = x_scr[...]                                          # (L, C) f32

    xn = _layernorm(x, g_ref[...], b_ref[...])
    qkv = _dot(_bf16(xn), wqkv_ref[...]) + bqkv_ref[...]    # (L, 3C), f32 accumulation

    for h in range(num_heads):                              # static unroll over heads
        qh = _bf16(qkv[:, h * D:(h + 1) * D] * scale)
        kh = _bf16(qkv[:, C + h * D:C + (h + 1) * D])
        vh = _bf16(qkv[:, 2 * C + h * D:2 * C + (h + 1) * D])
        s = _dot_nt(qh, kh)                                 # (L, L), bf16 MXU, f32 acc
        s = s - jnp.max(s, axis=-1, keepdims=True)
        p = jnp.exp(s)                                      # unnormalized
        denom = jnp.sum(p, axis=-1, keepdims=True)          # (L, 1)
        hv = _dot(_bf16(p), vh)                             # (L, D), bf16 MXU, f32 acc
        # normalize AFTER PV on the small (L, D) tile; store head at its concat offset.
        heads_scr[:, pl.ds(h * D, D)] = hv * pl.reciprocal(denom, approx=True)

    # single (L, C) @ (C, C) output projection == concat(heads) @ Wo
    out = _dot(_bf16(heads_scr[...]), wo_ref[...]) + bo_ref[...]
    y = x + out
    oxs_ref[0] = y[:HW, :]
    ocls_ref[0] = y[HW:, :]


def attn_block(x_cls, x_sp, p, num_heads):
    NT, HW, C = x_sp.shape
    L = HW + 1
    kernel = functools.partial(_attn_block_kernel, num_heads=num_heads)
    # TODO(synk): for very long sequences / v7x, add a second parallel query-tile grid axis
    #             (flash-style) so both TensorCores get work and the (L,L) score tile is capped.
    return pl.pallas_call(
        kernel,
        out_shape=(jax.ShapeDtypeStruct((NT, 1, C), jnp.float32),
                   jax.ShapeDtypeStruct((NT, HW, C), jnp.float32)),
        grid=(NT,),
        in_specs=[pl.BlockSpec((1, 1, C), lambda i: (i, 0, 0)),
                  pl.BlockSpec((1, HW, C), lambda i: (i, 0, 0)),
                  pl.BlockSpec((1, C), lambda i: (0, 0)),
                  pl.BlockSpec((1, C), lambda i: (0, 0)),
                  _const_wspec((C, 3 * C)),
                  pl.BlockSpec((1, 3 * C), lambda i: (0, 0)),
                  _const_wspec((C, C)),
                  pl.BlockSpec((1, C), lambda i: (0, 0))],
        out_specs=(pl.BlockSpec((1, 1, C), lambda i: (i, 0, 0)),
                   pl.BlockSpec((1, HW, C), lambda i: (i, 0, 0))),
        scratch_shapes=[pltpu.VMEM((L, C), jnp.float32),     # assembled token sequence
                        pltpu.VMEM((L, C), jnp.float32)],    # concatenated head outputs
        compiler_params=_cp(("parallel",)),
    )(x_cls, x_sp, p["ln_g"], p["ln_b"], p["w_qkv"], p["b_qkv"],
      p["w_out"], p["b_out"])


def _mlp_block_kernel(x_ref, g_ref, b_ref, wfc_ref, bfc_ref, wpr_ref, bpr_ref, o_ref):
    # fused: x + c_proj(QuickGELU(c_fc(ln_2(x))))   (token-wise, rows tiled)
    x = x_ref[...]
    xn = _layernorm(x, g_ref[...], b_ref[...])
    h = _dot(_bf16(xn), wfc_ref[...]) + bfc_ref[...]
    h = _quick_gelu(h)
    o = _dot(_bf16(h), wpr_ref[...]) + bpr_ref[...]
    o_ref[...] = x + o


def mlp_block(x, p, max_tile=256):
    shape = x.shape
    C = shape[-1]
    Ch = p["w_fc"].shape[1]
    x2 = x.reshape(-1, C)
    R = x2.shape[0]
    tr, Rp = _row_plan(R, max_tile)
    if Rp != R:
        x2 = jnp.concatenate([x2, jnp.zeros((Rp - R, C), x2.dtype)], axis=0)
    # TODO(synk): for C >= 1024 on v7x, additionally k-tile the 4C hidden dim with a grid axis
    #             + f32 accumulator instead of holding both full weight blocks in VMEM.
    out = pl.pallas_call(
        _mlp_block_kernel,
        out_shape=jax.ShapeDtypeStruct((Rp, C), jnp.float32),
        grid=(Rp // tr,),
        in_specs=[pl.BlockSpec((tr, C), lambda i: (i, 0)),
                  pl.BlockSpec((1, C), lambda i: (0, 0)),
                  pl.BlockSpec((1, C), lambda i: (0, 0)),
                  _const_wspec((C, Ch)),
                  pl.BlockSpec((1, Ch), lambda i: (0, 0)),
                  _const_wspec((Ch, C)),
                  pl.BlockSpec((1, C), lambda i: (0, 0))],
        out_specs=pl.BlockSpec((tr, C), lambda i: (i, 0)),
        compiler_params=_cp(("parallel",)),
    )(x2, p["ln_g"], p["ln_b"], p["w_fc"], p["b_fc"], p["w_proj"], p["b_proj"])
    if Rp != R:
        out = out[:R]
    return out.reshape(shape)


def _local_temporal_kernel(x_ref, g_ref, b_ref, wd_ref, bd_ref, wdw_ref, bdw_ref,
                           wu_ref, bu_ref, o_ref, pad_ref):
    # fused LocalTemporal + residual on the spatial stream only:
    #   x + up_proj(QuickGELU(dwconvT3(down_proj(LN(x)))))
    T, HW, C = x_ref.shape
    Cb = wd_ref.shape[1]
    xs = x_ref[...]                                         # (T, HW, C), full aligned tile
    xn = _layernorm(xs, g_ref[...], b_ref[...])
    xd = _dot(_bf16(xn.reshape(T * HW, C)), wd_ref[...]) + bd_ref[...]
    xd = xd.reshape(T, HW, Cb)

    # depthwise temporal conv (kernel 3, zero pad 1) via a zero-padded VMEM scratch and shifted
    # leading-axis window reads (no concatenate copies).
    pad_ref[pl.ds(1, T), :, :] = xd
    zeros_row = jnp.zeros((1, HW, Cb), jnp.float32)
    pad_ref[pl.ds(0, 1), :, :] = zeros_row
    pad_ref[pl.ds(T + 1, 1), :, :] = zeros_row
    x_prev = pad_ref[pl.ds(0, T), :, :]                     # [0, xd[0..T-2]]
    x_next = pad_ref[pl.ds(2, T), :, :]                     # [xd[1..T-1], 0]

    wdw = wdw_ref[...]                                      # (3, Cb); broadcasts hoisted
    w_p = wdw[0:1, :].reshape(1, 1, Cb)
    w_c = wdw[1:2, :].reshape(1, 1, Cb)
    w_n = wdw[2:3, :].reshape(1, 1, Cb)
    y = x_prev * w_p + xd * w_c + x_next * w_n + bdw_ref[...].reshape(1, 1, Cb)
    y = _quick_gelu(y)
    up = _dot(_bf16(y.reshape(T * HW, Cb)), wu_ref[...]) + bu_ref[...]
    o_ref[...] = xs + up.reshape(T, HW, C)


def local_temporal(x_sp, p, T):
    NT, HW, C = x_sp.shape
    N = NT // T
    Cb = p["w_down"].shape[1]
    # TODO(synk): on v7x, add a second parallel HW-tile grid axis (the temporal conv couples only
    #             along T) to cap VMEM blocks and give the second TensorCore work when N is small.
    return pl.pallas_call(
        _local_temporal_kernel,
        out_shape=jax.ShapeDtypeStruct((NT, HW, C), jnp.float32),
        grid=(N,),
        in_specs=[pl.BlockSpec((T, HW, C), lambda i: (i, 0, 0)),
                  pl.BlockSpec((1, C), lambda i: (0, 0)),
                  pl.BlockSpec((1, C), lambda i: (0, 0)),
                  _const_wspec((C, Cb)),
                  pl.BlockSpec((1, Cb), lambda i: (0, 0)),
                  pl.BlockSpec((3, Cb), lambda i: (0, 0)),
                  pl.BlockSpec((1, Cb), lambda i: (0, 0)),
                  _const_wspec((Cb, C)),
                  pl.BlockSpec((1, C), lambda i: (0, 0))],
        out_specs=pl.BlockSpec((T, HW, C), lambda i: (i, 0, 0)),
        scratch_shapes=[pltpu.VMEM((T + 2, HW, Cb), jnp.float32)],
        compiler_params=_cp(("parallel",)),
    )(x_sp, p["ln_g"], p["ln_b"], p["w_down"], p["b_down"], p["w_dw"], p["b_dw"],
      p["w_up"], p["b_up"])


# ----------------------------- parameters -----------------------------

def init_params(key, *, width, layers, heads, patch_size, input_resolution,
                output_dim, in_ch=3):
    del heads  # shapes only depend on width
    keys = iter(jax.random.split(key, 16 + 32 * layers))

    def nrm(shape, std=0.02, dtype=jnp.float32):
        return (std * jax.random.normal(next(keys), shape, jnp.float32)).astype(dtype)

    BF = jnp.bfloat16          # matmul weights in bf16; LN params / biases stay f32
    C = width
    Cb = C // 2
    L0 = (input_resolution // patch_size) ** 2 + 1

    def lmhra():
        return {
            "ln_g": jnp.ones((1, C), jnp.float32),
            "ln_b": jnp.zeros((1, C), jnp.float32),
            "w_down": nrm((C, Cb), dtype=BF), "b_down": nrm((1, Cb)),
            "w_dw": nrm((3, Cb)), "b_dw": nrm((1, Cb)),
            # torch zero-inits up_proj weight and bias (nn.init.constant_(..., 0)).
            "w_up": jnp.zeros((Cb, C), BF), "b_up": jnp.zeros((1, C), jnp.float32),
        }

    # conv1 weight defined in torch layout (width, 3, P, P), lowered to a matmul weight
    # with (p, q, c) row ordering matching the patch extraction in the forward pass.
    w_conv = nrm((C, in_ch, patch_size, patch_size))
    w_patch = jnp.transpose(w_conv, (2, 3, 1, 0)).reshape(
        patch_size * patch_size * in_ch, C).astype(BF)

    params = {
        "w_patch": w_patch,
        "class_embedding": nrm((C,)),
        "positional_embedding": nrm((L0, C)),
        "ln_pre_g": jnp.ones((1, C), jnp.float32),
        "ln_pre_b": jnp.zeros((1, C), jnp.float32),
        "ln_post_g": jnp.ones((1, C), jnp.float32),
        "ln_post_b": jnp.zeros((1, C), jnp.float32),
        "proj": nrm((C, output_dim)),   # defined by the module; not applied in forward()
        "layers": [],
    }
    for _ in range(layers):
        params["layers"].append({
            "lmhra1": lmhra(),
            "lmhra2": lmhra(),
            "attn": {
                "ln_g": jnp.ones((1, C), jnp.float32),
                "ln_b": jnp.zeros((1, C), jnp.float32),
                "w_qkv": nrm((C, 3 * C), dtype=BF),
                "b_qkv": jnp.zeros((1, 3 * C), jnp.float32),
                "w_out": nrm((C, C), dtype=BF),
                "b_out": jnp.zeros((1, C), jnp.float32),
            },
            "mlp": {
                "ln_g": jnp.ones((1, C), jnp.float32),
                "ln_b": jnp.zeros((1, C), jnp.float32),
                "w_fc": nrm((C, 4 * C), dtype=BF),
                "b_fc": jnp.zeros((1, 4 * C), jnp.float32),
                "w_proj": nrm((4 * C, C), dtype=BF),
                "b_proj": jnp.zeros((1, C), jnp.float32),
            },
        })
    return params


# ----------------------------- forward -----------------------------

def video_former_forward(params, x, *, patch_size, heads):
    B, Cin, T, H, W = x.shape
    P = patch_size
    Gh, Gw = H // P, W // P
    HW = Gh * Gw
    NT = B * T
    C = params["positional_embedding"].shape[-1]

    # --- patch extraction (pure layout) ---
    x_cl = jnp.transpose(x, (0, 2, 3, 4, 1))                         # (B,T,H,W,3)
    patches = x_cl.reshape(B, T, Gh, P, Gw, P, Cin)
    patches = jnp.transpose(patches, (0, 1, 2, 4, 3, 5, 6))
    patches = patches.reshape(NT, HW, P * P * Cin).astype(jnp.bfloat16)

    # --- fused: Conv3d(k=s=(1,P,P)) as matmul + positional embedding + ln_pre ---
    pos_sp = params["positional_embedding"][1:]                      # spatial rows of pos emb
    xt_sp = patch_embed(patches, params["w_patch"], pos_sp,
                        params["ln_pre_g"], params["ln_pre_b"])      # (NT, HW, C) f32

    # --- cls token: identical for every (b, t); pos-add + ln_pre computed once (tiny) ---
    cls_vec = params["class_embedding"] + params["positional_embedding"][0]
    mu = jnp.mean(cls_vec)
    var = jnp.mean(jnp.square(cls_vec - mu))
    cls_vec = (cls_vec - mu) * jax.lax.rsqrt(var + EPS) * params["ln_pre_g"][0] \
        + params["ln_pre_b"][0]
    xt_cls = jnp.broadcast_to(cls_vec.reshape(1, 1, C), (NT, 1, C))

    # --- TemporalTransformer: cls / spatial streams kept separate (all residuals in-kernel) ---
    for lp in params["layers"]:
        xt_sp = local_temporal(xt_sp, lp["lmhra1"], T)
        xt_cls, xt_sp = attn_block(xt_cls, xt_sp, lp["attn"], heads)
        xt_sp = local_temporal(xt_sp, lp["lmhra2"], T)
        xt_cls = mlp_block(xt_cls, lp["mlp"])
        xt_sp = mlp_block(xt_sp, lp["mlp"])

    # --- head: average cls over time, flatten patch tokens over (t, hw), ln_post ---
    cls_mean = jnp.mean(xt_cls.reshape(B, T, C), axis=1)             # (B, C)
    cls_out = layernorm(cls_mean, params["ln_post_g"], params["ln_post_b"])
    rest = layernorm(xt_sp.reshape(B * T * HW, C),
                     params["ln_post_g"], params["ln_post_b"]).reshape(B, T * HW, C)
    return jnp.concatenate([cls_out.reshape(B, 1, C), rest], axis=1)


# ----------------------------- main -----------------------------

if __name__ == "__main__":
    B, T = 2, 4
    input_resolution, patch_size = 16, 8
    width, layers, heads, output_dim = 32, 2, 4, 16

    key = jax.random.PRNGKey(0)
    kx, kp = jax.random.split(key)
    x = jax.random.normal(kx, (B, 3, T, input_resolution, input_resolution), jnp.float32)
    params = init_params(kp, width=width, layers=layers, heads=heads,
                         patch_size=patch_size, input_resolution=input_resolution,
                         output_dim=output_dim)

    out = video_former_forward(params, x, patch_size=patch_size, heads=heads)
    out = jax.block_until_ready(out)

    HW = (input_resolution // patch_size) ** 2
    assert out.shape == (B, 1 + T * HW, width), out.shape
    assert jnp.all(jnp.isfinite(out))
    print("KERNEL_OK")
</pallas_src>

<mosaic_0001>
module attributes {stable_mosaic.version = 11 : i64} {
  func.func @_patch_embed_kernel(%arg0: i32, %arg1: memref<1x4x192xbf16, #tpu.memory_space<vmem>>, %arg2: memref<192x32xbf16, #tpu.memory_space<vmem>>, %arg3: memref<4x32xf32, #tpu.memory_space<vmem>>, %arg4: memref<1x32xf32, #tpu.memory_space<vmem>>, %arg5: memref<1x32xf32, #tpu.memory_space<vmem>>, %arg6: memref<1x4x32xf32, #tpu.memory_space<vmem>>) attributes {dimension_semantics = [#tpu.dimension_semantics<parallel>], iteration_bounds = array<i64: 8>, scalar_prefetch = 0 : i64, scratch_operands = 0 : i64, tpu.core_type = #tpu.core_type<tc>, window_params = [{transform_indices = @transform_0, window_bounds = array<i64: 1, 4, 192>}, {pipeline_mode = #tpu.pipeline_mode<synchronous>, transform_indices = @transform_1, window_bounds = array<i64: 192, 32>}, {pipeline_mode = #tpu.pipeline_mode<synchronous>, transform_indices = @transform_2, window_bounds = array<i64: 4, 32>}, {pipeline_mode = #tpu.pipeline_mode<synchronous>, transform_indices = @transform_3, window_bounds = array<i64: 1, 32>}, {pipeline_mode = #tpu.pipeline_mode<synchronous>, transform_indices = @transform_4, window_bounds = array<i64: 1, 32>}, {transform_indices = @transform_5, window_bounds = array<i64: 1, 4, 32>}]} {
    %c0 = arith.constant 0 : index
    %c0_0 = arith.constant 0 : index
    %c0_1 = arith.constant 0 : index
    %0 = vector.load %arg1[%c0, %c0_0, %c0_1] : memref<1x4x192xbf16, #tpu.memory_space<vmem>>, vector<1x4x192xbf16>
    %1 = vector.shape_cast %0 : vector<1x4x192xbf16> to vector<4x192xbf16>
    %c0_2 = arith.constant 0 : index
    %c0_3 = arith.constant 0 : index
    %2 = vector.load %arg2[%c0_2, %c0_3] : memref<192x32xbf16, #tpu.memory_space<vmem>>, vector<192x32xbf16>
    %cst = arith.constant dense<0.000000e+00> : vector<4x32xf32>
    %3 = tpu.matmul %1, %2, %cst {dimension_numbers = #tpu.dot_dimension_numbers<[1], [0], [0], [1], [0, 0, 1, 1], [], []>} : vector<4x192xbf16>, vector<192x32xbf16>, vector<4x32xf32> -> vector<4x32xf32>
    %c0_4 = arith.constant 0 : index
    %c0_5 = arith.constant 0 : index
    %4 = vector.load %arg3[%c0_4, %c0_5] : memref<4x32xf32, #tpu.memory_space<vmem>>, vector<4x32xf32>
    %5 = arith.addf %3, %4 : vector<4x32xf32>
    %c0_6 = arith.constant 0 : index
    %c0_7 = arith.constant 0 : index
    %6 = vector.load %arg4[%c0_6, %c0_7] : memref<1x32xf32, #tpu.memory_space<vmem>>, vector<1x32xf32>
    %c0_8 = arith.constant 0 : index
    %c0_9 = arith.constant 0 : index
    %7 = vector.load %arg5[%c0_8, %c0_9] : memref<1x32xf32, #tpu.memory_space<vmem>>, vector<1x32xf32>
    %cst_10 = arith.constant dense<0.000000e+00> : vector<4xf32>
    %8 = vector.multi_reduction <add>, %5, %cst_10 [1] : vector<4x32xf32> to vector<4xf32>
    %9 = vector.shape_cast %8 : vector<4xf32> to vector<4x1xf32>
    %cst_11 = arith.constant 3.200000e+01 : f32
    %10 = vector.broadcast %cst_11 : f32 to vector<4x1xf32>
    %11 = arith.divf %9, %10 : vector<4x1xf32>
    %12 = vector.broadcast %11 : vector<4x1xf32> to vector<4x32xf32>
    %13 = arith.subf %5, %12 : vector<4x32xf32>
    %14 = arith.mulf %13, %13 : vector<4x32xf32>
    %cst_12 = arith.constant dense<0.000000e+00> : vector<4xf32>
    %15 = vector.multi_reduction <add>, %14, %cst_12 [1] : vector<4x32xf32> to vector<4xf32>
    %16 = vector.shape_cast %15 : vector<4xf32> to vector<4x1xf32>
    %cst_13 = arith.constant 3.200000e+01 : f32
    %17 = vector.broadcast %cst_13 : f32 to vector<4x1xf32>
    %18 = arith.divf %16, %17 : vector<4x1xf32>
    %19 = vector.broadcast %11 : vector<4x1xf32> to vector<4x32xf32>
    %20 = arith.subf %5, %19 : vector<4x32xf32>
    %cst_14 = arith.constant 9.99999974E-6 : f32
    %21 = vector.broadcast %cst_14 : f32 to vector<4x1xf32>
    %22 = arith.addf %18, %21 : vector<4x1xf32>
    %23 = math.rsqrt %22 : vector<4x1xf32>
    %24 = vector.broadcast %23 : vector<4x1xf32> to vector<4x32xf32>
    %25 = arith.mulf %20, %24 : vector<4x32xf32>
    %26 = vector.broadcast %6 : vector<1x32xf32> to vector<4x32xf32>
    %27 = arith.mulf %25, %26 : vector<4x32xf32>
    %28 = vector.broadcast %7 : vector<1x32xf32> to vector<4x32xf32>
    %29 = arith.addf %27, %28 : vector<4x32xf32>
    %c0_15 = arith.constant 0 : index
    %c0_16 = arith.constant 0 : index
    %c0_17 = arith.constant 0 : index
    %30 = vector.load %arg6[%c0_15, %c0_16, %c0_17] : memref<1x4x32xf32, #tpu.memory_space<vmem>>, vector<1x4x32xf32>
    %31 = vector.shape_cast %30 : vector<1x4x32xf32> to vector<4x32xf32>
    %32 = vector.shape_cast %29 : vector<4x32xf32> to vector<1x4x32xf32>
    tpu.vector_store %arg6[%c0_15, %c0_16, %c0_17], %32 {strides = array<i32>} : memref<1x4x32xf32, #tpu.memory_space<vmem>>, vector<1x4x32xf32>,
    return
  }
  func.func @transform_0(%arg0: i32) -> (i32, i32, i32) {
    %c0_i32 = arith.constant 0 : i32
    %c0_i32_0 = arith.constant 0 : i32
    %c0_i32_1 = arith.constant 0 : i32
    return %arg0, %c0_i32, %c0_i32_0 : i32, i32, i32
  }
  func.func @transform_1(%arg0: i32) -> (i32, i32) {
    %c0_i32 = arith.constant 0 : i32
    %c0_i32_0 = arith.constant 0 : i32
    %c0_i32_1 = arith.constant 0 : i32
    return %c0_i32, %c0_i32_0 : i32, i32
  }
  func.func @transform_2(%arg0: i32) -> (i32, i32) {
    %c0_i32 = arith.constant 0 : i32
    %c0_i32_0 = arith.constant 0 : i32
    %c0_i32_1 = arith.constant 0 : i32
    return %c0_i32, %c0_i32_0 : i32, i32
  }
  func.func @transform_3(%arg0: i32) -> (i32, i32) {
    %c0_i32 = arith.constant 0 : i32
    %c0_i32_0 = arith.constant 0 : i32
    %c0_i32_1 = arith.constant 0 : i32
    return %c0_i32, %c0_i32_0 : i32, i32
  }
  func.func @transform_4(%arg0: i32) -> (i32, i32) {
    %c0_i32 = arith.constant 0 : i32
    %c0_i32_0 = arith.constant 0 : i32
    %c0_i32_1 = arith.constant 0 : i32
    return %c0_i32, %c0_i32_0 : i32, i32
  }
  func.func @transform_5(%arg0: i32) -> (i32, i32, i32) {
    %c0_i32 = arith.constant 0 : i32
    %c0_i32_0 = arith.constant 0 : i32
    %c0_i32_1 = arith.constant 0 : i32
    return %arg0, %c0_i32, %c0_i32_0 : i32, i32, i32
  }
}

</mosaic_0001>

<bundles_post_ra>
// kernel: tpu_custom_call.1
= control target key start
LH: loop header
LB: loop body
LE: loop exit
PB: predicated region body
PF: predicated region fallthrough
CT: control target
= control target key end

     0   :  { %10 = vsyncpa [#allocation3], 0  ;;  %s792_s0 = inlined_call_operand.vmem [shape: bf16[8,4,192], index: 0, kind: input, shape index: {}]   ;;  %s793_s1 = inlined_call_operand.vmem [shape: bf16[192,32], index: 1, kind: input, shape index: {}]   ;;  %s794_s2 = inlined_call_operand.vmem [shape: f32[4,32], index: 2, kind: input, shape index: {}]   ;;  %s795_s3 = inlined_call_operand.vmem [shape: f32[1,32], index: 3, kind: input, shape index: {}]   ;;  %s796_s4 = inlined_call_operand.vmem [shape: f32[1,32], index: 4, kind: input, shape index: {}]   ;;  %s797_s5 = inlined_call_operand.hbm [shape: f32[8,4,32], index: 5, kind: output, shape index: {}]  }
   0x1   :  { %12 = vsyncpa [#allocation3 + $0x1], 0  ;;  %s657_s18 = smov 0   ;;  %s659_s19 = smov 0  }
   0x2   :  { %s661_s20 = smov 0   ;;  %s663_s21 = smov 0  }
   0x3 LB: > { %s678_s22 = sadd.s32 4294967295, %s623_s21   ;;  %s481_s23 = sadd.s32 4294967294, %s623_s21   ;;  %s623_s21 = sphi %s663_s21, %s803_s21   ;;  %s619_s20 = sphi %s661_s20, %s802_s20   ;;  %s615_s19 = sphi %s659_s19, %s801_s19   ;;  %s611_s18 = sphi %s657_s18, %s800_s18  }
   0x4   : > { %s682_s24 = sadd.s32 1, %s623_s21   ;;  %s135_s25 = sadd.s32 1, %s619_s20 }
   0x5   : > { %s132_s26 = ssub.s32 %s623_s21, %s682_s24  ;;  %p145_p0 = scmp.ne.s32.totalorder %s619_s20, %s615_s19 }
   0x6   : > { %p133_p1 = scmp.eq.s32.totalorder %s132_s26, 0  ;;  %p146_p2 = scmp.eq.s32.totalorder %s678_s22, 7 }
   0x7   : > { %p151_p3 = scmp.ne.s32.totalorder %s615_s19, %s611_s18  ;;  %p152_p4 = scmp.eq.s32.totalorder %s481_s23, 7 }
   0x8   : > { %s693_s27 = scalar_select %p133_p1, %s619_s20, %s135_s25  }
   0x9   : > { %p695_p5 = por %p146_p2, %p145_p0  ;;  %p699_p6 = por %p152_p4, %p151_p3 }
   0xa   : > { %p484_p7 = scmp.ge.s32.totalorder %s623_s21, 1  ;;  %p190_p8 = scmp.lt.s32.totalorder %s623_s21, 9 }
   0xc   : > { %p191_p9 = pnand %p484_p7, %p190_p8 }
   0xd   : > { %p218_p10 = scmp.lt.s32.totalorder (!%p191_p9), %s678_s22, 7  ;;  %s215_s26 = sand.u32 (!%p191_p9), 1, %s615_s19  }
   0xe   : > { %194 = sbr.rel (%p191_p9) target bundleno = 584 (0x248), region = 40  ;;  %s485_s30 = sshll.u32 (!%p191_p9), %s215_s26, 2 }
   0xf   : > { %s505_s10 = sshll.u32 (!%p191_p9), %s678_s22, 6  ;;  %s217_s11 = scalar_lea.vmem (!%p191_p9), [#allocation2], %s485_s30 }
  0x10   : > { %s409_s16 = scalar_lea.sflag (!%p191_p9), [#allocation3], %s215_s26  ;;  %s626_s23 = smov (!%p191_p9), [#allocation2]  }
  0x11   : > { %s567_s25 = sshll.u32 (!%p191_p9), %s626_s23, 4  ;;  %s568_s25 = int_to_ptr.vmem [resolvable:$false] %s567_s25 }
  0x13   : > { %v549_v0 = vld [vmem:[%s793_s1 + $0x38] sm:$0xff]   ;;  %v625_v1 = vmov 0   ;;  %v550_v2 = vld [vmem:[%s793_s1 + $0x30] sm:$0xff]   ;;  %s219_s9 = scalar_select %p218_p10, %s678_s22, 7  ;;  %v551_v3 = vld [vmem:[%s793_s1 + $0x28] sm:$0xff]   ;;  %vm332_vm0 = vcmask 523264  }
  0x14   : > { %336 = vmatprep.subr.bf16.mxu0 %v625_v1  ;;  %v552_v4 = vld [vmem:[%s793_s1 + $0x20] sm:$0xff]   ;;  %v553_v7 = vld [vmem:[%s793_s1 + $0x18] sm:$0xff]   ;;  %v554_v8 = vld [vmem:[%s793_s1 + $0x10] sm:$0xff]   ;;  %vm378_vm1 = vcmask 257024   ;;  %s569_s22 = scalar_lea.vmem %s568_s25, 128 }
  0x15   : > { %337 = vmatpush1.bf16.msra.mxu0 %v549_v0  ;;  %s508_s12 = sshll.u32 %s219_s9, 2  ;;  %v555_v9 = vld [vmem:[%s793_s1 + $0x8] sm:$0xff]   ;;  %v556_v10 = vld [vmem:[%s793_s1] sm:$0xff]   ;;  %v557_v11 = vld [vmem:[%s793_s1 + $0x58] sm:$0xff]  }
  0x16   : > { %338 = vmatprep.subr.bf16.mxu0 %v625_v1  ;;  %s222_s15 = scalar_lea.vmem %s792_s0, %s508_s12  ;;  %v558_v12 = vld [vmem:[%s793_s1 + $0x50] sm:$0xff]   ;;  %v559_v13 = vld [vmem:[%s793_s1 + $0x48] sm:$0xff]   ;;  %v560_v14 = vld [vmem:[%s793_s1 + $0x40] sm:$0xff]   ;;  %s422_s12 = sshll.u32 %s217_s11, 4  ;;  %s423_s12 = int_to_ptr.vmem [resolvable:$true] %s422_s12 }
  0x17   : > { %v488_v5 = vld.sshfl [vmem:[%s222_s15] sm:$0x33 pattern:$0x76325410]  ;;  %s420_s15 = scalar_lea.hbm %s797_s5, %s505_s10  ;;  %s563_s17 = scalar_lea.vmem %s423_s12, 64 }
  0x18   : > { %v258_v6 = vcombine.high %v488_v5, %v488_v5  ;;  %v249_v15 = vld [vmem:[%s794_s2] sm:$0xf]  ;;  %p564_p11 = scmp.ne.s32.totalorder %s423_s12, %s563_s17  ;;  %p570_p0 = scmp.lt.s32.totalorder %s423_s12, %s568_s25 }
  0x19   : > { %339 = vmatpush1.bf16.msra.mxu0 %v550_v2  ;;  %v502_v31 = vld [vmem:[%s795_s3] ss:$0 sm:$0xff]  ;;  %p571_p1 = scmp.lt.s32.totalorder %s569_s22, %s563_s17 }
  0x1a   : > { %340 = vmatprep.subr.bf16.mxu0 %v625_v1  ;;  %501 = vmatprep.mubr.msk.bf16.mxu0 %vm332_vm0, %v258_v6  ;;  %v503_v33 = vld [vmem:[%s796_s4] ss:$0 sm:$0xff]  ;;  %p565_p12 = pnand %p564_p11, %p695_p5 }
  0x1b   : > { %p572_p2 = por %p571_p1, %p570_p0 }
  0x1c   : > { %p566_p13 = pneg %p565_p12 }
  0x1d   : > { %341 = vmatpush1.bf16.msra.mxu0 %v551_v3 }
  0x1e   : > { %342 = vmatprep.subr.bf16.mxu0 %v625_v1  ;;  %p573_p3 = pnand %p572_p2, %p566_p13 }
  0x21   : > { %343 = vmatpush1.bf16.msra.mxu0 %v552_v4 }
  0x22   : > { %344 = vmatprep.subr.bf16.mxu0 %v625_v1 }
  0x25   : > { %345 = vmatpush1.bf16.msra.mxu0 %v553_v7 }
  0x26   : > { %346 = vmatprep.subr.bf16.mxu0 %v625_v1 }
  0x29   : > { %347 = vmatpush1.bf16.msra.mxu0 %v554_v8 }
  0x2a   : > { %348 = vmatprep.subr.bf16.mxu0 %v625_v1 }
  0x2d   : > { %349 = vmatpush1.bf16.msra.mxu0 %v555_v9 }
  0x2e   : > { %350 = vmatprep.subr.bf16.mxu0 %v625_v1 }
  0x31   : > { %351 = vmatpush1.bf16.msra.mxu0 %v556_v10 }
  0x32   : > { %360 = vmatprep.subr.bf16.mxu0 %v625_v1 }
  0x35   : > { %361 = vmatpush2.bf16.msra.mxu0 %v557_v11 }
  0x36   : > { %362 = vmatprep.subr.bf16.mxu0 %v625_v1 }
  0x39   : > { %363 = vmatpush2.bf16.msra.mxu0 %v558_v12 }
  0x3a   : > { %364 = vmatprep.subr.bf16.mxu0 %v625_v1 }
  0x3d   : > { %365 = vmatpush2.bf16.msra.mxu0 %v559_v13 }
  0x3e   : > { %366 = vmatprep.subr.bf16.mxu0 %v625_v1 }
  0x41   : > { %367 = vmatpush2.bf16.msra.mxu0 %v560_v14 }
  0x44   : > { %369 = vmatmul.mubr.bf16.vlgmr.msra.gmra.mxu0 %v488_v5 }
 0x104   : > { %v370_v16 = vpop.f32.mrf.mxu0 }
 0x105   : > { %v371_v17 = vadd.f32 %v370_v16, %v249_v15 }
 0x106   : > { %v372_v18 = vpop.f32.mrf.mxu0 }
 0x107   : > { %v379_v19 = vsel %vm378_vm1, %v371_v17, 0.0 }
 0x108   : > { %v373_v20 = vpop.f32.mrf.mxu0  ;;  %380 = vadd.xlane.f32.xlu0 %v379_v19 }
 0x10a   : > { %v374_v21 = vpop.f32.mrf.mxu0 }
 0x191   : > { %v381_v22 = vpop.xlane.xlu0 %380 }
 0x192   : > { %v383_v23 = vmul.f32 0.03125, %v381_v22 }
 0x194   : > { %v384_v24 = vsub.f32 %v371_v17, %v383_v23 }
 0x196   : > { %v385_v25 = vmul.f32 %v384_v24, %v384_v24 }
 0x198   : > { %v386_v26 = vsel %vm378_vm1, %v385_v25, 0.0 }
 0x199   : > { %387 = vadd.xlane.f32.xlu0 %v386_v26 }
 0x222   : > { %v388_v27 = vpop.xlane.xlu0 %387 }
 0x223   : > { %v389_v28 = vmul.f32 0.03125, %v388_v27 }
 0x225   : > { %v390_v29 = vadd.f32 1e-05, %v389_v28 }
 0x227   : > { %561 = vrsqrt.f32 %v390_v29 }
 0x234   : > { %v562_v30 = vpop.eup %561 }
 0x235   : > { %v392_v32 = vmul.f32 %v562_v30, %v384_v24 }
 0x237   : > { %v399_v34 = vmul.f32 %v502_v31, %v392_v32 }
 0x239   : > { %v406_v35 = vadd.f32 %v503_v33, %v399_v34 }
 0x23b   : > { %407 = vst.msk [vmem:[%s217_s11] sm:$0xf] %vm378_vm1, %v406_v35 }
 0x23c   : > { %576 = shalt.err (!%p573_p3)
}
 0x23d   : > { %s577_s30 = scalar_lea.hbm %s420_s15, 64  ;;  %s581_s7 = scalar_lea.hbm %s797_s5, 512 }
 0x23e   : > { %p578_p4 = scmp.ne.s32.totalorder %s420_s15, %s577_s30  ;;  %p582_p9 = scmp.lt.s32.totalorder %s420_s15, %s797_s5 }
 0x23f   : > { %p583_p10 = scmp.lt.s32.totalorder %s581_s7, %s577_s30 }
 0x240   : > { %p579_p7 = pnand %p578_p4, %p695_p5 }
 0x241   : > { %p584_p11 = por %p583_p10, %p582_p9 }
 0x242   : > { %p580_p8 = pneg %p579_p7 }
 0x244   : > { %p585_p12 = pnand %p584_p11, %p580_p8 }
 0x246   : > { %588 = shalt.err (!%p585_p12)
}
 0x247   : > { %509 = dma.vmem_to_hbm [thread:$0]  (%p695_p5), %s423_s12, 64, %s420_s15, %s409_s16  }
 0x248 PF: > { %p515_p13 = scmp.ge.s32.totalorder %s623_s21, 2  ;;  %s434_s10 = sand.u32 1, %s611_s18  }
 0x249   : > { %s435_s11 = scalar_lea.sflag [#allocation3], %s434_s10 }
 0x24a   : > { %p512_p0 = pnand %p515_p13, %p699_p6 }
 0x24c   : > { %p513_p1 = pneg %p512_p0 }
 0x24e   : > { %606 = dma.done.wait (%p513_p1), %s435_s11, 64  }
 0x24f   : > { %608 = vsyncadd (%p513_p1), %s435_s11, 4294967232  ;;  %p15_p2 = scmp.ge.s32.totalorder %s682_s24, 10   ;;  %s800_s18 = smov %s615_s19 }
 0x250   : > { %s801_s19 = smov %s619_s20  ;;  %s802_s20 = smov %s693_s27 }
 0x251   : > { %s803_s21 = smov %s682_s24  ;;  %17 = sbr.rel (!%p15_p2) target bundleno = 3 (0x3), region = 75 }
 0x256   :  { %440 = vsyncpa [#allocation3], 1 }
 0x257   :  { %442 = vsyncpa [#allocation3 + $0x1], 1 }

</bundles_post_ra>
